<compile_context>
chip_gen: v7x
topology: tpu7x:2x2x1
jax: 0.10.0
libtpu: 0.0.40
codegen_flags: <defaults>
</compile_context>

<pallas_src>
import jax
import jax.numpy as jnp
from jax.experimental import pallas as pl
from jax.experimental.pallas import tpu as pltpu


def _dft_matrices(H, W, m1, m2):
    """Real/imag truncated DFT matrices for the forward and inverse transforms."""
    h = jnp.arange(H, dtype=jnp.float32)
    w = jnp.arange(W, dtype=jnp.float32)
    k1 = jnp.arange(m1, dtype=jnp.float32)
    k2 = jnp.arange(m2, dtype=jnp.float32)
    ang_h = (2.0 * jnp.pi / H) * k1[:, None] * h[None, :]        # (m1, H)
    ang_w = (2.0 * jnp.pi / W) * k2[:, None] * w[None, :]        # (m2, W)
    s_h = 1.0 / jnp.sqrt(jnp.float32(H))
    s_w = 1.0 / jnp.sqrt(jnp.float32(W))

    # Forward (ortho rfft2 corner): Fh[k1,h] = exp(-2πi k1 h / H)/sqrt(H); same for Fw.
    fhR = jnp.cos(ang_h) * s_h
    fhI = -jnp.sin(ang_h) * s_h
    fwR = jnp.cos(ang_w) * s_w
    fwI = -jnp.sin(ang_w) * s_w

    # Stacked real form: [[FhR, -FhI], [FhI, FhR]] @ [TR; TI] = [XcR; XcI].
    fh2 = jnp.block([[fhR, -fhI], [fhI, fhR]])                   # (2*m1, 2*H)
    fwRT = fwR.T                                                 # (W, m2)
    fwIT = fwI.T                                                 # (W, m2)

    # Inverse (ortho irfft2 with only the (m1,m2) corner nonzero):
    #   out = Re(Gh @ Y @ Gw^T), Gh[h,k1] = exp(+2πi k1 h/H)/sqrt(H),
    #   Gw[w,k2] = c_k2 exp(+2πi k2 w/W)/sqrt(W), c_0 = 1, c_{k2>0} = 2.
    ghR = fhR.T                                                  # (H, m1)
    ghI = -fhI.T                                                 # (H, m1)
    gh2 = jnp.block([[ghR, -ghI], [ghI, ghR]])                   # (2*H, 2*m1)
    c = jnp.where(jnp.arange(m2) == 0, 1.0, 2.0).astype(jnp.float32)[:, None]
    gwRT = c * fwR                                               # (m2, W)  == Gw_R^T
    gwIT = -c * fwI                                              # (m2, W)  == Gw_I^T
    return fwRT, fwIT, fh2, gh2, gwRT, gwIT


def _spectral_conv2d_kernel(x_ref, fwrt_ref, fwit_ref, fh2_ref, wr_ref, wi_ref,
                            gh2_ref, gwrt_ref, gwit_ref, o_ref):
    # x_ref : (1, Cin, H, W)       o_ref : (1, Cout, H, W)
    _, c_in, H, W = x_ref.shape
    c_out = wr_ref.shape[1]
    m1, m2 = wr_ref.shape[2], wr_ref.shape[3]

    x = x_ref[0]                                         # (Cin, H, W)
    xm = x.reshape(c_in * H, W)                          # leading-dim collapse: free

    # ---- forward width DFT (contract W): one matmul pair over all input channels ----
    tR = jnp.dot(xm, fwrt_ref[...], preferred_element_type=jnp.float32)   # (Cin*H, m2)
    tI = jnp.dot(xm, fwit_ref[...], preferred_element_type=jnp.float32)   # (Cin*H, m2)
    tR = tR.reshape(c_in, H, m2)                          # free
    tI = tI.reshape(c_in, H, m2)                          # free

    # ---- forward height DFT (contract H): one channel-batched stacked-real matmul ----
    t2 = jnp.concatenate([tR, tI], axis=1)                                # (Cin, 2H, m2)
    fh2 = jnp.broadcast_to(fh2_ref[...], (c_in, 2 * m1, 2 * H))
    xc2 = jnp.einsum('ckh,chm->ckm', fh2, t2,
                     preferred_element_type=jnp.float32)                  # (Cin, 2*m1, m2)
    xcR = xc2[:, :m1, :]                                                  # (Cin, m1, m2)
    xcI = xc2[:, m1:, :]

    # ---- per-mode complex channel mix: vectorized on the VPU (reduce leading Cin) ----
    wr = wr_ref[...]                                                      # (Cin, Cout, m1, m2)
    wi = wi_ref[...]
    xcR4 = xcR[:, None, :, :]                                             # (Cin, 1, m1, m2)
    xcI4 = xcI[:, None, :, :]
    yR = jnp.sum(xcR4 * wr - xcI4 * wi, axis=0)                           # (Cout, m1, m2)
    yI = jnp.sum(xcR4 * wi + xcI4 * wr, axis=0)                           # (Cout, m1, m2)

    # ---- inverse height DFT (contract m1): one channel-batched stacked-real matmul ----
    y2 = jnp.concatenate([yR, yI], axis=1)                                # (Cout, 2*m1, m2)
    gh2 = jnp.broadcast_to(gh2_ref[...], (c_out, 2 * H, 2 * m1))
    q2 = jnp.einsum('chk,ckm->chm', gh2, y2,
                    preferred_element_type=jnp.float32)                   # (Cout, 2H, m2)
    qR = q2[:, :H, :].reshape(c_out * H, m2)                              # free collapse
    qI = q2[:, H:, :].reshape(c_out * H, m2)                              # free collapse

    # ---- inverse width DFT (contract m2): one matmul pair over all output channels ----
    out = (jnp.dot(qR, gwrt_ref[...], preferred_element_type=jnp.float32)
           - jnp.dot(qI, gwit_ref[...], preferred_element_type=jnp.float32))  # (Cout*H, W)
    o_ref[0] = out.reshape(c_out, H, W).astype(o_ref.dtype)


def spectral_conv2d(x: jnp.ndarray, weights1: jnp.ndarray,
                    modes1: int, modes2: int) -> jnp.ndarray:
    """x: (B, Cin, H, W) f32; weights1: (Cin, Cout, modes1, modes2, 2) f32
       -> (B, Cout, H, W) f32 (forward pass of SpectralConv2d)."""
    B, c_in, H, W = x.shape
    c_out = weights1.shape[1]
    m1 = min(modes1, H // 2)
    m2 = min(modes2, W // 2)

    wr = weights1[:, :, :m1, :m2, 0].astype(jnp.float32)        # (Cin, Cout, m1, m2)
    wi = weights1[:, :, :m1, :m2, 1].astype(jnp.float32)
    fwRT, fwIT, fh2, gh2, gwRT, gwIT = _dft_matrices(H, W, m1, m2)

    return pl.pallas_call(
        _spectral_conv2d_kernel,
        out_shape=jax.ShapeDtypeStruct((B, c_out, H, W), x.dtype),
        grid_spec=pltpu.PrefetchScalarGridSpec(
            num_scalar_prefetch=0,
            grid=(B,),
            in_specs=[
                pl.BlockSpec((1, c_in, H, W), lambda b: (b, 0, 0, 0)),
                pl.BlockSpec((W, m2), lambda b: (0, 0)),
                pl.BlockSpec((W, m2), lambda b: (0, 0)),
                pl.BlockSpec((2 * m1, 2 * H), lambda b: (0, 0)),
                pl.BlockSpec((c_in, c_out, m1, m2), lambda b: (0, 0, 0, 0)),
                pl.BlockSpec((c_in, c_out, m1, m2), lambda b: (0, 0, 0, 0)),
                pl.BlockSpec((2 * H, 2 * m1), lambda b: (0, 0)),
                pl.BlockSpec((m2, W), lambda b: (0, 0)),
                pl.BlockSpec((m2, W), lambda b: (0, 0)),
            ],
            out_specs=pl.BlockSpec((1, c_out, H, W), lambda b: (b, 0, 0, 0)),
        ),
        compiler_params=pltpu.CompilerParams(
            dimension_semantics=("parallel",),
        ),
    )(x, fwRT, fwIT, fh2, wr, wi, gh2, gwRT, gwIT)


def _spectral_conv2d_ref(x, weights1, modes1, modes2):
    """Pure-JAX reference mirroring the PyTorch forward (uses real FFTs)."""
    B, c_in, H, W = x.shape
    c_out = weights1.shape[1]
    m1 = min(modes1, H // 2)
    m2 = min(modes2, W // 2)
    x_ft = jnp.fft.rfft2(x, norm="ortho")                        # (B, Cin, H, W//2+1)
    wc = (weights1[..., 0] + 1j * weights1[..., 1])[:, :, :m1, :m2]
    corner = jnp.einsum("bixy,ioxy->boxy", x_ft[:, :, :m1, :m2], wc)
    out_ft = jnp.zeros((B, c_out, H, W // 2 + 1), dtype=jnp.complex64)
    out_ft = out_ft.at[:, :, :m1, :m2].set(corner)
    return jnp.fft.irfft2(out_ft, s=(H, W), norm="ortho")


if __name__ == "__main__":
    key = jax.random.PRNGKey(0)
    kx, kw = jax.random.split(key)
    B, c_in, c_out, H, W = 2, 4, 4, 16, 16
    modes1 = modes2 = 8

    x = jax.random.normal(kx, (B, c_in, H, W), dtype=jnp.float32)
    scale = 1.0 / (c_in * c_out)
    weights1 = scale * jax.random.normal(
        kw, (c_in, c_out, modes1, modes2, 2), dtype=jnp.float32)
    # NOTE: the PyTorch module also defines weights2, but it is unused in forward().

    out = jax.block_until_ready(spectral_conv2d(x, weights1, modes1, modes2))
    assert out.shape == (B, c_out, H, W), out.shape

    ref = jax.block_until_ready(_spectral_conv2d_ref(x, weights1, modes1, modes2))
    err = float(jnp.max(jnp.abs(out - ref)))
    assert err < 5e-3, err

    print("KERNEL_OK")
</pallas_src>

<mosaic_0001>
module attributes {stable_mosaic.version = 11 : i64} {
  func.func @_spectral_conv2d_kernel(%arg0: i32, %arg1: memref<1x4x16x16xf32, #tpu.memory_space<vmem>>, %arg2: memref<16x8xf32, #tpu.memory_space<vmem>>, %arg3: memref<16x8xf32, #tpu.memory_space<vmem>>, %arg4: memref<16x32xf32, #tpu.memory_space<vmem>>, %arg5: memref<4x4x8x8xf32, #tpu.memory_space<vmem>>, %arg6: memref<4x4x8x8xf32, #tpu.memory_space<vmem>>, %arg7: memref<32x16xf32, #tpu.memory_space<vmem>>, %arg8: memref<8x16xf32, #tpu.memory_space<vmem>>, %arg9: memref<8x16xf32, #tpu.memory_space<vmem>>, %arg10: memref<1x4x16x16xf32, #tpu.memory_space<vmem>>) attributes {dimension_semantics = [#tpu.dimension_semantics<parallel>], iteration_bounds = array<i64: 2>, scalar_prefetch = 0 : i64, scratch_operands = 0 : i64, tpu.core_type = #tpu.core_type<tc>, window_params = [{transform_indices = @transform_0, window_bounds = array<i64: 1, 4, 16, 16>}, {pipeline_mode = #tpu.pipeline_mode<synchronous>, transform_indices = @transform_1, window_bounds = array<i64: 16, 8>}, {pipeline_mode = #tpu.pipeline_mode<synchronous>, transform_indices = @transform_2, window_bounds = array<i64: 16, 8>}, {pipeline_mode = #tpu.pipeline_mode<synchronous>, transform_indices = @transform_3, window_bounds = array<i64: 16, 32>}, {pipeline_mode = #tpu.pipeline_mode<synchronous>, transform_indices = @transform_4, window_bounds = array<i64: 4, 4, 8, 8>}, {pipeline_mode = #tpu.pipeline_mode<synchronous>, transform_indices = @transform_5, window_bounds = array<i64: 4, 4, 8, 8>}, {pipeline_mode = #tpu.pipeline_mode<synchronous>, transform_indices = @transform_6, window_bounds = array<i64: 32, 16>}, {pipeline_mode = #tpu.pipeline_mode<synchronous>, transform_indices = @transform_7, window_bounds = array<i64: 8, 16>}, {pipeline_mode = #tpu.pipeline_mode<synchronous>, transform_indices = @transform_8, window_bounds = array<i64: 8, 16>}, {transform_indices = @transform_9, window_bounds = array<i64: 1, 4, 16, 16>}]} {
    %c0 = arith.constant 0 : index
    %c0_0 = arith.constant 0 : index
    %c0_1 = arith.constant 0 : index
    %c0_2 = arith.constant 0 : index
    %0 = vector.load %arg1[%c0, %c0_0, %c0_1, %c0_2] : memref<1x4x16x16xf32, #tpu.memory_space<vmem>>, vector<1x4x16x16xf32>
    %1 = vector.shape_cast %0 : vector<1x4x16x16xf32> to vector<4x16x16xf32>
    %2 = vector.shape_cast %1 : vector<4x16x16xf32> to vector<64x16xf32>
    %c0_3 = arith.constant 0 : index
    %c0_4 = arith.constant 0 : index
    %3 = vector.load %arg2[%c0_3, %c0_4] : memref<16x8xf32, #tpu.memory_space<vmem>>, vector<16x8xf32>
    %cst = arith.constant dense<0.000000e+00> : vector<64x8xf32>
    %4 = tpu.matmul %2, %3, %cst {dimension_numbers = #tpu.dot_dimension_numbers<[1], [0], [0], [1], [0, 0, 1, 1], [], []>} : vector<64x16xf32>, vector<16x8xf32>, vector<64x8xf32> -> vector<64x8xf32>
    %c0_5 = arith.constant 0 : index
    %c0_6 = arith.constant 0 : index
    %5 = vector.load %arg3[%c0_5, %c0_6] : memref<16x8xf32, #tpu.memory_space<vmem>>, vector<16x8xf32>
    %cst_7 = arith.constant dense<0.000000e+00> : vector<64x8xf32>
    %6 = tpu.matmul %2, %5, %cst_7 {dimension_numbers = #tpu.dot_dimension_numbers<[1], [0], [0], [1], [0, 0, 1, 1], [], []>} : vector<64x16xf32>, vector<16x8xf32>, vector<64x8xf32> -> vector<64x8xf32>
    %7 = vector.shape_cast %4 : vector<64x8xf32> to vector<4x16x8xf32>
    %8 = vector.shape_cast %6 : vector<64x8xf32> to vector<4x16x8xf32>
    %9 = tpu.concatenate %7, %8 in 1 : vector<4x16x8xf32>, vector<4x16x8xf32> -> vector<4x32x8xf32>
    %c0_8 = arith.constant 0 : index
    %c0_9 = arith.constant 0 : index
    %10 = vector.load %arg4[%c0_8, %c0_9] : memref<16x32xf32, #tpu.memory_space<vmem>>, vector<16x32xf32>
    %11 = vector.shape_cast %10 : vector<16x32xf32> to vector<1x16x32xf32>
    %12 = vector.broadcast %11 : vector<1x16x32xf32> to vector<4x16x32xf32>
    "tpu.trace_start"() <{level = 10 : i32, message = "ckh,chm->ckm"}> : () -> ()
    %cst_10 = arith.constant dense<0.000000e+00> : vector<4x16x8xf32>
    %13 = tpu.matmul %12, %9, %cst_10 {dimension_numbers = #tpu.dot_dimension_numbers<[2], [1], [1], [2], [0, 0, 0, 1, 1, 2], [0], [0]>} : vector<4x16x32xf32>, vector<4x32x8xf32>, vector<4x16x8xf32> -> vector<4x16x8xf32>
    "tpu.trace_stop"() : () -> ()
    %14 = vector.extract_strided_slice %13 {offsets = [0, 0, 0], sizes = [4, 8, 8], strides = [1, 1, 1]} : vector<4x16x8xf32> to vector<4x8x8xf32>
    %15 = vector.extract_strided_slice %13 {offsets = [0, 8, 0], sizes = [4, 8, 8], strides = [1, 1, 1]} : vector<4x16x8xf32> to vector<4x8x8xf32>
    %c0_11 = arith.constant 0 : index
    %c0_12 = arith.constant 0 : index
    %c0_13 = arith.constant 0 : index
    %c0_14 = arith.constant 0 : index
    %16 = vector.load %arg5[%c0_11, %c0_12, %c0_13, %c0_14] : memref<4x4x8x8xf32, #tpu.memory_space<vmem>>, vector<4x4x8x8xf32>
    %c0_15 = arith.constant 0 : index
    %c0_16 = arith.constant 0 : index
    %c0_17 = arith.constant 0 : index
    %c0_18 = arith.constant 0 : index
    %17 = vector.load %arg6[%c0_15, %c0_16, %c0_17, %c0_18] : memref<4x4x8x8xf32, #tpu.memory_space<vmem>>, vector<4x4x8x8xf32>
    %18 = vector.shape_cast %14 : vector<4x8x8xf32> to vector<4x1x8x8xf32>
    %19 = vector.shape_cast %15 : vector<4x8x8xf32> to vector<4x1x8x8xf32>
    %20 = vector.broadcast %18 : vector<4x1x8x8xf32> to vector<4x4x8x8xf32>
    %21 = arith.mulf %20, %16 : vector<4x4x8x8xf32>
    %22 = vector.broadcast %19 : vector<4x1x8x8xf32> to vector<4x4x8x8xf32>
    %23 = arith.mulf %22, %17 : vector<4x4x8x8xf32>
    %24 = arith.subf %21, %23 : vector<4x4x8x8xf32>
    %cst_19 = arith.constant dense<0.000000e+00> : vector<4x8x8xf32>
    %25 = vector.multi_reduction <add>, %24, %cst_19 [0] : vector<4x4x8x8xf32> to vector<4x8x8xf32>
    %26 = vector.broadcast %18 : vector<4x1x8x8xf32> to vector<4x4x8x8xf32>
    %27 = arith.mulf %26, %17 : vector<4x4x8x8xf32>
    %28 = vector.broadcast %19 : vector<4x1x8x8xf32> to vector<4x4x8x8xf32>
    %29 = arith.mulf %28, %16 : vector<4x4x8x8xf32>
    %30 = arith.addf %27, %29 : vector<4x4x8x8xf32>
    %cst_20 = arith.constant dense<0.000000e+00> : vector<4x8x8xf32>
    %31 = vector.multi_reduction <add>, %30, %cst_20 [0] : vector<4x4x8x8xf32> to vector<4x8x8xf32>
    %32 = tpu.concatenate %25, %31 in 1 : vector<4x8x8xf32>, vector<4x8x8xf32> -> vector<4x16x8xf32>
    %c0_21 = arith.constant 0 : index
    %c0_22 = arith.constant 0 : index
    %33 = vector.load %arg7[%c0_21, %c0_22] : memref<32x16xf32, #tpu.memory_space<vmem>>, vector<32x16xf32>
    %34 = vector.shape_cast %33 : vector<32x16xf32> to vector<1x32x16xf32>
    %35 = vector.broadcast %34 : vector<1x32x16xf32> to vector<4x32x16xf32>
    "tpu.trace_start"() <{level = 10 : i32, message = "chk,ckm->chm"}> : () -> ()
    %cst_23 = arith.constant dense<0.000000e+00> : vector<4x32x8xf32>
    %36 = tpu.matmul %35, %32, %cst_23 {dimension_numbers = #tpu.dot_dimension_numbers<[2], [1], [1], [2], [0, 0, 0, 1, 1, 2], [0], [0]>} : vector<4x32x16xf32>, vector<4x16x8xf32>, vector<4x32x8xf32> -> vector<4x32x8xf32>
    "tpu.trace_stop"() : () -> ()
    %37 = vector.extract_strided_slice %36 {offsets = [0, 0, 0], sizes = [4, 16, 8], strides = [1, 1, 1]} : vector<4x32x8xf32> to vector<4x16x8xf32>
    %38 = vector.shape_cast %37 : vector<4x16x8xf32> to vector<64x8xf32>
    %39 = vector.extract_strided_slice %36 {offsets = [0, 16, 0], sizes = [4, 16, 8], strides = [1, 1, 1]} : vector<4x32x8xf32> to vector<4x16x8xf32>
    %40 = vector.shape_cast %39 : vector<4x16x8xf32> to vector<64x8xf32>
    %c0_24 = arith.constant 0 : index
    %c0_25 = arith.constant 0 : index
    %41 = vector.load %arg8[%c0_24, %c0_25] : memref<8x16xf32, #tpu.memory_space<vmem>>, vector<8x16xf32>
    %cst_26 = arith.constant dense<0.000000e+00> : vector<64x16xf32>
    %42 = tpu.matmul %38, %41, %cst_26 {dimension_numbers = #tpu.dot_dimension_numbers<[1], [0], [0], [1], [0, 0, 1, 1], [], []>} : vector<64x8xf32>, vector<8x16xf32>, vector<64x16xf32> -> vector<64x16xf32>
    %c0_27 = arith.constant 0 : index
    %c0_28 = arith.constant 0 : index
    %43 = vector.load %arg9[%c0_27, %c0_28] : memref<8x16xf32, #tpu.memory_space<vmem>>, vector<8x16xf32>
    %cst_29 = arith.constant dense<0.000000e+00> : vector<64x16xf32>
    %44 = tpu.matmul %40, %43, %cst_29 {dimension_numbers = #tpu.dot_dimension_numbers<[1], [0], [0], [1], [0, 0, 1, 1], [], []>} : vector<64x8xf32>, vector<8x16xf32>, vector<64x16xf32> -> vector<64x16xf32>
    %45 = arith.subf %42, %44 : vector<64x16xf32>
    %46 = vector.shape_cast %45 : vector<64x16xf32> to vector<4x16x16xf32>
    %c0_30 = arith.constant 0 : index
    %c0_31 = arith.constant 0 : index
    %c0_32 = arith.constant 0 : index
    %c0_33 = arith.constant 0 : index
    %47 = vector.load %arg10[%c0_30, %c0_31, %c0_32, %c0_33] : memref<1x4x16x16xf32, #tpu.memory_space<vmem>>, vector<1x4x16x16xf32>
    %48 = vector.shape_cast %47 : vector<1x4x16x16xf32> to vector<4x16x16xf32>
    %49 = vector.shape_cast %46 : vector<4x16x16xf32> to vector<1x4x16x16xf32>
    tpu.vector_store %arg10[%c0_30, %c0_31, %c0_32, %c0_33], %49 {strides = array<i32>} : memref<1x4x16x16xf32, #tpu.memory_space<vmem>>, vector<1x4x16x16xf32>,
    return
  }
  func.func @transform_0(%arg0: i32) -> (i32, i32, i32, i32) {
    %c0_i32 = arith.constant 0 : i32
    %c0_i32_0 = arith.constant 0 : i32
    %c0_i32_1 = arith.constant 0 : i32
    %c0_i32_2 = arith.constant 0 : i32
    return %arg0, %c0_i32, %c0_i32_0, %c0_i32_1 : i32, i32, i32, i32
  }
  func.func @transform_1(%arg0: i32) -> (i32, i32) {
    %c0_i32 = arith.constant 0 : i32
    %c0_i32_0 = arith.constant 0 : i32
    %c0_i32_1 = arith.constant 0 : i32
    return %c0_i32, %c0_i32_0 : i32, i32
  }
  func.func @transform_2(%arg0: i32) -> (i32, i32) {
    %c0_i32 = arith.constant 0 : i32
    %c0_i32_0 = arith.constant 0 : i32
    %c0_i32_1 = arith.constant 0 : i32
    return %c0_i32, %c0_i32_0 : i32, i32
  }
  func.func @transform_3(%arg0: i32) -> (i32, i32) {
    %c0_i32 = arith.constant 0 : i32
    %c0_i32_0 = arith.constant 0 : i32
    %c0_i32_1 = arith.constant 0 : i32
    return %c0_i32, %c0_i32_0 : i32, i32
  }
  func.func @transform_4(%arg0: i32) -> (i32, i32, i32, i32) {
    %c0_i32 = arith.constant 0 : i32
    %c0_i32_0 = arith.constant 0 : i32
    %c0_i32_1 = arith.constant 0 : i32
    %c0_i32_2 = arith.constant 0 : i32
    %c0_i32_3 = arith.constant 0 : i32
    return %c0_i32, %c0_i32_0, %c0_i32_1, %c0_i32_2 : i32, i32, i32, i32
  }
  func.func @transform_5(%arg0: i32) -> (i32, i32, i32, i32) {
    %c0_i32 = arith.constant 0 : i32
    %c0_i32_0 = arith.constant 0 : i32
    %c0_i32_1 = arith.constant 0 : i32
    %c0_i32_2 = arith.constant 0 : i32
    %c0_i32_3 = arith.constant 0 : i32
    return %c0_i32, %c0_i32_0, %c0_i32_1, %c0_i32_2 : i32, i32, i32, i32
  }
  func.func @transform_6(%arg0: i32) -> (i32, i32) {
    %c0_i32 = arith.constant 0 : i32
    %c0_i32_0 = arith.constant 0 : i32
    %c0_i32_1 = arith.constant 0 : i32
    return %c0_i32, %c0_i32_0 : i32, i32
  }
  func.func @transform_7(%arg0: i32) -> (i32, i32) {
    %c0_i32 = arith.constant 0 : i32
    %c0_i32_0 = arith.constant 0 : i32
    %c0_i32_1 = arith.constant 0 : i32
    return %c0_i32, %c0_i32_0 : i32, i32
  }
  func.func @transform_8(%arg0: i32) -> (i32, i32) {
    %c0_i32 = arith.constant 0 : i32
    %c0_i32_0 = arith.constant 0 : i32
    %c0_i32_1 = arith.constant 0 : i32
    return %c0_i32, %c0_i32_0 : i32, i32
  }
  func.func @transform_9(%arg0: i32) -> (i32, i32, i32, i32) {
    %c0_i32 = arith.constant 0 : i32
    %c0_i32_0 = arith.constant 0 : i32
    %c0_i32_1 = arith.constant 0 : i32
    %c0_i32_2 = arith.constant 0 : i32
    return %arg0, %c0_i32, %c0_i32_0, %c0_i32_1 : i32, i32, i32, i32
  }
}

</mosaic_0001>

<bundles_post_ra>
// kernel: tpu_custom_call.1
= control target key start
LH: loop header
LB: loop body
LE: loop exit
PB: predicated region body
PF: predicated region fallthrough
CT: control target
= control target key end

     0   :  { %14 = vsyncpa [#allocation3], 0  ;;  %s3027_s0 = inlined_call_operand.hbm [shape: f32[2,4,16,16], index: 0, kind: input, shape index: {}]   ;;  %s3028_s1 = inlined_call_operand.vmem [shape: f32[16,8], index: 1, kind: input, shape index: {}]   ;;  %s3029_s2 = inlined_call_operand.vmem [shape: f32[16,8], index: 2, kind: input, shape index: {}]   ;;  %s3030_s3 = inlined_call_operand.vmem [shape: f32[16,32], index: 3, kind: input, shape index: {}]   ;;  %s3031_s4 = inlined_call_operand.hbm [shape: f32[4,4,8,8], index: 4, kind: input, shape index: {}]   ;;  %s3032_s5 = inlined_call_operand.hbm [shape: f32[4,4,8,8], index: 5, kind: input, shape index: {}]   ;;  %s3033_s6 = inlined_call_operand.vmem [shape: f32[32,16], index: 6, kind: input, shape index: {}]   ;;  %s3034_s7 = inlined_call_operand.vmem [shape: f32[8,16], index: 7, kind: input, shape index: {}]   ;;  %s3035_s8 = inlined_call_operand.vmem [shape: f32[8,16], index: 8, kind: input, shape index: {}]   ;;  %s3036_s9 = inlined_call_operand.hbm [shape: f32[2,4,16,16], index: 9, kind: output, shape index: {}]  }
   0x1   :  { %16 = vsyncpa [#allocation3 + $0x1], 0 }
   0x2   :  { %17 = vsyncpa [#allocation6], 0 }
   0x3   :  { %18 = vsyncpa [#allocation4], 0 }
   0x4   :  { %20 = vsyncpa [#allocation4 + $0x1], 0  ;;  %s2508_s30 = smov 0   ;;  %s2510_s10 = smov 0  }
   0x5   :  { %s2512_s11 = smov 0   ;;  %s2514_s12 = smov 0  }
   0x6 LB: > { %s2529_s13 = sadd.s32 4294967295, %s2448_s12   ;;  %s1859_s14 = sadd.s32 4294967294, %s2448_s12   ;;  %s2448_s12 = sphi %s2514_s12, %s3063_s12   ;;  %s2444_s11 = sphi %s2512_s11, %s3062_s11   ;;  %s2440_s10 = sphi %s2510_s10, %s3061_s10   ;;  %s2436_s30 = sphi %s2508_s30, %s3060_s30  }
   0x7   : > { %p46_p0 = scmp.ne.s32.totalorder %s2440_s10, %s2436_s30  ;;  %p3037_p1 = scmp.eq.s32.totalorder %s2529_s13, 0 }
   0x8   : > { %p244_p3 = scmp.eq.s32.totalorder %s1859_s14, 1  ;;  %p1860_p5 = scmp.ge.s32.totalorder %s2448_s12, 1 }
   0x9   : > { %p2538_p4 = por %p3037_p1, %p46_p0  ;;  %p251_p7 = scmp.lt.s32.totalorder %s2448_s12, 3 }
   0xa   : > { %p2543_p6 = por %p244_p3, %p46_p0  ;;  %s2450_s18 = smov [#allocation5]  }
   0xb   : > { %s3043_s15 = scalar_select %p2538_p4, 1, 0 }
   0xc   : > { %s3044_s16 = scalar_select %p2543_p6, 1, 0 }
   0xd   : > { %p2548_p8 = pnand %p1860_p5, %p251_p7  ;;  %s272_s19 = sshll.u32 %s2450_s18, 4  ;;  %s2552_s19 = int_to_ptr.vmem [resolvable:$true] %s272_s19 }
   0xe   : > { %3045 = sst [smem:[#allocation12_spill]] %s3044_s16  ;;  %s2451_s21 = smov [#allocation7]  }
   0xf   : > { %p2233_p9 = pneg %p2548_p8  ;;  %s285_s22 = sshll.u32 %s2451_s21, 4  ;;  %s2563_s22 = int_to_ptr.vmem [resolvable:$true] %s285_s22 }
  0x10   : > { %s2292_s25 = scalar_lea.hbm %s3031_s4, 2048 }
  0x11   : > { %p2559_p11 = pnand %p2233_p9, %p3037_p1  ;;  %p2293_p12 = scmp.ne.s32.totalorder %s3031_s4, %s2292_s25 }
  0x12   : > { %p2299_p5 = scmp.lt.u32.totalorder %s2292_s25, %s3031_s4 }
  0x13   : > { %p2294_p13 = pneg %p2559_p11 }
  0x15   : > { %p2295_p0 = pnand %p2294_p13, %p2293_p12 }
  0x17   : > { %p2296_p3 = pneg %p2295_p0 }
  0x19   : > { %p2301_p7 = pnand %p2299_p5, %p2296_p3 }
  0x1b   : > { %2304 = shalt.err (!%p2301_p7)
}
  0x1c   : > { %s2305_s14 = scalar_lea.vmem %s2552_s19, 2048  ;;  %p2313_p2 = scmp.lt.s32.totalorder %s2552_s19, %s2552_s19 }
  0x1d   : > { %p2306_p9 = scmp.ne.s32.totalorder %s2552_s19, %s2305_s14  ;;  %p2314_p12 = scmp.lt.s32.totalorder %s2305_s14, %s2305_s14 }
  0x1f   : > { %p2308_p10 = pnand %p2306_p9, %p2294_p13  ;;  %p2315_p0 = por %p2314_p12, %p2313_p2 }
  0x21   : > { %p2309_p1 = pneg %p2308_p10 }
  0x23   : > { %p2316_p6 = pnand %p2315_p0, %p2309_p1 }
  0x25   : > { %2319 = shalt.err (!%p2316_p6)
}
  0x26   : > { %s3039_s18 = smov 128   ;;  %s3040_s21 = smov 8  }
  0x27   : > { %2236 = dma.hbm_to_vmem [thread:$0]  (!%p2559_p11), %s3031_s4, 2048, %s2552_s19, [#allocation6], %s3039_s18, %s3039_s18, %s3040_s21  }
  0x28   : > { %s2320_s27 = scalar_lea.hbm %s3032_s5, 2048 }
  0x29   : > { %p2321_p1 = scmp.ne.s32.totalorder %s3032_s5, %s2320_s27  ;;  %p2327_p10 = scmp.lt.u32.totalorder %s2320_s27, %s3032_s5 }
  0x2b   : > { %p2323_p2 = pnand %p2321_p1, %p2294_p13 }
  0x2d   : > { %p2324_p6 = pneg %p2323_p2 }
  0x2f   : > { %p2329_p3 = pnand %p2327_p10, %p2324_p6 }
  0x31   : > { %2332 = shalt.err (!%p2329_p3)
}
  0x32   : > { %s2333_s19 = scalar_lea.vmem %s2563_s22, 2048  ;;  %p2341_p12 = scmp.lt.s32.totalorder %s2563_s22, %s2563_s22 }
  0x33   : > { %p2334_p5 = scmp.ne.s32.totalorder %s2563_s22, %s2333_s19  ;;  %p2342_p0 = scmp.lt.s32.totalorder %s2333_s19, %s2333_s19 }
  0x35   : > { %p2336_p7 = pnand %p2334_p5, %p2294_p13  ;;  %p2343_p1 = por %p2342_p0, %p2341_p12 }
  0x37   : > { %p2337_p9 = pneg %p2336_p7 }
  0x39   : > { %p2344_p2 = pnand %p2343_p1, %p2337_p9 }
  0x3b   : > { %2347 = shalt.err (!%p2344_p2)
}
  0x3c   : > { %2239 = dma.hbm_to_vmem [thread:$0]  (!%p2559_p11), %s3032_s5, 2048, %s2563_s22, [#allocation6], %s3039_s18, %s3039_s18, %s3040_s21  }
  0x3d   : > { %s2624_s20 = sadd.s32 1, %s2448_s12   ;;  %s33_s24 = sadd.s32 1, %s2444_s11 }
  0x3e   : > { %s30_s25 = ssub.s32 %s2448_s12, %s2624_s20  ;;  %p40_p13 = scmp.ne.s32.totalorder %s2444_s11, %s2440_s10 }
  0x3f   : > { %p31_p6 = scmp.eq.s32.totalorder %s30_s25, 0  ;;  %p41_p10 = scmp.eq.s32.totalorder %s2448_s12, 0 }
  0x40   : > { %p3048_p3 = scmp.eq.s32.totalorder %s2529_s13, 1  ;;  %p2250_p7 = scmp.lt.s32.totalorder %s2448_s12, 2 }
  0x41   : > { %s2640_s27 = scalar_select %p31_p6, %s2444_s11, %s33_s24  }
  0x42   : > { %p2634_p5 = por %p3048_p3, %p40_p13  ;;  %p42_p9 = por %p41_p10, %p40_p13 }
  0x43   : > { %s308_s28 = sand.u32 1, %s2444_s11   ;;  %s1933_s22 = sshll.u32 %s2448_s12, 10 }
  0x44   : > { %s3049_s26 = scalar_select %p2634_p5, 1, 0 }
  0x45   : > { %s1864_s29 = sshll.u32 %s308_s28, 6  ;;  %s2647_s16 = scalar_lea.hbm %s3027_s0, %s1933_s22 }
  0x46   : > { %s312_s23 = scalar_lea.vmem [#allocation2], %s1864_s29  ;;  %p2651_p11 = pnand %p2250_p7, %p42_p9 }
  0x47   : > { %s319_s25 = sshll.u32 %s312_s23, 4  ;;  %s2655_s18 = scalar_lea.sflag [#allocation3], %s308_s28  ;;  %s2649_s25 = int_to_ptr.vmem [resolvable:$true] %s319_s25 }
  0x48   : > { %s2348_s21 = scalar_lea.hbm %s2647_s16, 1024  ;;  %p2350_p0 = pneg %p2651_p11 }
  0x49   : > { %p2349_p12 = scmp.ne.s32.totalorder %s2647_s16, %s2348_s21  ;;  %s2353_s14 = scalar_lea.hbm %s3027_s0, 2048 }
  0x4a   : > { %p2354_p13 = scmp.lt.u32.totalorder %s2647_s16, %s3027_s0  ;;  %p2355_p6 = scmp.lt.u32.totalorder %s2353_s14, %s2348_s21 }
  0x4b   : > { %p2351_p1 = pnand %p2350_p0, %p2349_p12  ;;  %p2357_p3 = scmp.lt.u32.totalorder %s2348_s21, %s2647_s16 }
  0x4c   : > { %p2356_p10 = por %p2355_p6, %p2354_p13 }
  0x4d   : > { %p2352_p2 = pneg %p2351_p1 }
  0x4e   : > { %p2358_p7 = por %p2357_p3, %p2356_p10 }
  0x50   : > { %p2359_p9 = pnand %p2358_p7, %p2352_p2 }
  0x52   : > { %2362 = shalt.err (!%p2359_p9)
}
  0x53   : > { %s2363_s28 = scalar_lea.vmem %s2649_s25, 1024  ;;  %s2454_s29 = smov [#allocation2]  }
  0x54   : > { %p2364_p12 = scmp.ne.s32.totalorder %s2649_s25, %s2363_s28  ;;  %s2368_s22 = sshll.u32 %s2454_s29, 4  ;;  %s2369_s22 = int_to_ptr.vmem [resolvable:$false] %s2368_s22 }
  0x55   : > { %s2370_s19 = scalar_lea.vmem %s2369_s22, 2048  ;;  %p2371_p4 = scmp.lt.s32.totalorder %s2649_s25, %s2369_s22 }
  0x56   : > { %p2366_p1 = pnand %p2364_p12, %p2350_p0  ;;  %p2372_p13 = scmp.lt.s32.totalorder %s2370_s19, %s2363_s28 }
  0x58   : > { %p2367_p5 = pneg %p2366_p1  ;;  %p2373_p6 = por %p2372_p13, %p2371_p4 }
  0x5a   : > { %p2374_p10 = pnand %p2373_p6, %p2367_p5 }
  0x5c   : > { %2377 = shalt.err (!%p2374_p10)
}
  0x5d   : > { %s3051_s21 = smov 8   ;;  %s3052_s14 = smov 128  }
  0x5e   : > { %2243 = dma.hbm_to_vmem [thread:$0]  (!%p2651_p11), %s2647_s16, 1024, %s2649_s25, %s2655_s18, %s3052_s14, %s3052_s14, %s3051_s21  }
  0x5f   : > { %331 = sbr.rel (%p2548_p8) target bundleno = 1046 (0x416), region = 56  ;;  %s2689_s23 = sand.u32 (!%p2548_p8), 1, %s2440_s10  }
  0x60   : > { %s1868_s28 = sshll.u32 (!%p2548_p8), %s2689_s23, 6  ;;  %s334_s29 = scalar_lea.sflag (!%p2548_p8), [#allocation3], %s2689_s23 }
  0x61   : > { %s2695_s24 = scalar_lea.vmem (!%p2548_p8), [#allocation2], %s1868_s28  ;;  %p3053_p4 = scmp.ne.s32.totalorder (!%p2548_p8), %s3043_s15, 0 }
  0x66   : > { %2423 = dma.done.wait (%p3053_p4), %s334_s29, 1024  }
  0x67   : > { %2425 = vsyncadd (%p3053_p4), %s334_s29, 4294966272  ;;  %p3054_p5 = scmp.eq.s32.totalorder %s2529_s13, 0 }
  0x69   : > { %2427 = dma.done.wait (%p3054_p5), [#allocation6], 4096   ;;  %p3055_p8 = pmov %p3054_p5 }
  0x6a   : > { %vm390_vm0 = vcmask 130048   ;;  %v388_v0 = vld [vmem:[%s3028_s1] sm:$0xff]  ;;  %v389_v1 = vld [vmem:[%s3028_s1 + $0x8] sm:$0xff]  ;;  %v382_v8 = vld [vmem:[%s2695_s24 + $0x10] sm:$0xff]  ;;  %vm629_vm1 = vcmask 261120   ;;  %vm1016_vm2 = vcmask 64512  }
  0x6b   : > { %2429 = vsyncadd (%p3055_p8), [#allocation6], 4294963200  ;;  %v380_v2 = vld [vmem:[%s2695_s24] sm:$0xff]  ;;  %v2165_v3 = vpack.c.bf16 %v389_v1, %v388_v0  ;;  %v521_v5 = vld [vmem:[%s3029_s2 + $0x8] sm:$0xff]  ;;  %s379_s16 = scalar_lea.vmem [#allocation8], %s1868_s28  ;;  %s1934_s28 = sshll.u32 %s2529_s13, 10 }
  0x6c   : > { %2025 = vmatprep.mubr.msk.f32.mxu0 %vm390_vm0, %v380_v2  ;;  %v520_v4 = vld [vmem:[%s3029_s2] sm:$0xff]  ;;  %2041 = vmatprep.mubr.msk.f32.mxu1 %vm390_vm0, %v380_v2  ;;  %v381_v7 = vld [vmem:[%s2695_s24 + $0x8] sm:$0xff]  ;;  %v383_v9 = vld [vmem:[%s2695_s24 + $0x18] sm:$0xff]  ;;  %s1767_s25 = sshll.u32 %s379_s16, 4  ;;  %s2979_s19 = scalar_lea.hbm %s3036_s9, %s1934_s28  ;;  %s2981_s25 = int_to_ptr.vmem [resolvable:$true] %s1767_s25 }
  0x6d   : > { %v2169_v6 = vpack.c.bf16 %v521_v5, %v520_v4  ;;  %2166 = vmatprep.subr.bf16.mxu0 %v2165_v3  ;;  %v384_v10 = vld [vmem:[%s2695_s24 + $0x20] sm:$0xff]  ;;  %v385_v11 = vld [vmem:[%s2695_s24 + $0x28] sm:$0xff]  ;;  %v386_v12 = vld [vmem:[%s2695_s24 + $0x30] sm:$0xff]  ;;  %s1754_s13 = scalar_lea.sflag [#allocation4], %s2689_s23  ;;  %s2378_s21 = scalar_lea.vmem %s2981_s25, 1024 }
  0x6e   : > { %2168 = vmatpush3.bf16.msra.mxu0 %v2165_v3  ;;  %v387_v13 = vld [vmem:[%s2695_s24 + $0x38] sm:$0xff]  ;;  %v627_v14 = vld [vmem:[%s3030_s3] sm:$0xff]  ;;  %v628_v30 = vld [vmem:[%s3030_s3 + $0x8] sm:$0xff]  ;;  %p2379_p11 = scmp.ne.s32.totalorder %s2981_s25, %s2378_s21  ;;  %p3056_p0 = scmp.ne.s32.totalorder %s3049_s26, 0 }
  0x6f   : > { %2170 = vmatprep.subr.bf16.mxu1 %v2169_v6  ;;  %v2758_v40 = vld [vmem:[%s3033_s6] sm:$0xff]  ;;  %v937_v43 = vld [vmem:[#allocation5 + $0x8] sm:$0xff]  ;;  %v938_v46 = vld [vmem:[#allocation5 + $0x10] sm:$0xff]  ;;  %s2455_s14 = smov [#allocation8]  }
  0x70   : > { %2172 = vmatpush3.bf16.msra.mxu1 %v2169_v6  ;;  %v936_v41 = vld [vmem:[#allocation5] sm:$0xff]  ;;  %v953_v44 = vld [vmem:[#allocation7 + $0x8] sm:$0xff]  ;;  %v954_v47 = vld [vmem:[#allocation7 + $0x10] sm:$0xff]  ;;  %p2380_p2 = pnand %p2379_p11, %p3056_p0  ;;  %s2382_s29 = sshll.u32 %s2455_s14, 4  ;;  %s2383_s29 = int_to_ptr.vmem [resolvable:$false] %s2382_s29 }
  0x71   : > { %2026 = vmatmul.mubr.msk.f32.vlgmr.msra.gmra.mrb[0].mxu0 %vm390_vm0, %v381_v7  ;;  %v952_v42 = vld [vmem:[#allocation7] sm:$0xff]  ;;  %v941_v57 = vld [vmem:[#allocation5 + $0x28] sm:$0xff]  ;;  %s2384_s24 = scalar_lea.vmem %s2383_s29, 2048  ;;  %p2385_p7 = scmp.lt.s32.totalorder %s2981_s25, %s2383_s29 }
  0x72   : > { %2028 = vmatprep.mubr.msk.f32.mxu0 %vm390_vm0, %v382_v8  ;;  %v940_v49 = vld [vmem:[#allocation5 + $0x20] sm:$0xff]  ;;  %v957_v58 = vld [vmem:[#allocation7 + $0x28] sm:$0xff]  ;;  %p2381_p3 = pneg %p2380_p2  ;;  %p2386_p9 = scmp.lt.s32.totalorder %s2384_s24, %s2378_s21 }
  0x73   : > { %2042 = vmatmul.mubr.msk.f32.vlgmr.msra.gmra.mrb[0].mxu1 %vm390_vm0, %v381_v7  ;;  %v956_v54 = vld [vmem:[#allocation7 + $0x20] sm:$0xff] }
  0x74   : > { %2044 = vmatprep.mubr.msk.f32.mxu1 %vm390_vm0, %v382_v8  ;;  %p2387_p12 = por %p2386_p9, %p2385_p7 }
  0x75   : > { %2029 = vmatmul.mubr.msk.f32.gmra.mrb[2].mxu0 %vm390_vm0, %v383_v9 }
  0x76   : > { %2031 = vmatprep.mubr.msk.f32.mxu0 %vm390_vm0, %v384_v10  ;;  %p2388_p1 = pnand %p2387_p12, %p2381_p3 }
  0x77   : > { %2045 = vmatmul.mubr.msk.f32.gmra.mrb[2].mxu1 %vm390_vm0, %v383_v9 }
  0x78   : > { %2047 = vmatprep.mubr.msk.f32.mxu1 %vm390_vm0, %v384_v10 }
  0x79   : > { %2032 = vmatmul.mubr.msk.f32.gmra.mrb[4].mxu0 %vm390_vm0, %v385_v11 }
  0x7a   : > { %2034 = vmatprep.mubr.msk.f32.mxu0 %vm390_vm0, %v386_v12 }
  0x7b   : > { %2048 = vmatmul.mubr.msk.f32.gmra.mrb[4].mxu1 %vm390_vm0, %v385_v11  ;;  %v2798_v11 = vld [vmem:[#allocation5 + $0x30] sm:$0xff] }
  0x7c   : > { %2050 = vmatprep.mubr.msk.f32.mxu1 %vm390_vm0, %v386_v12  ;;  %v2800_v12 = vld [vmem:[#allocation7 + $0x30] sm:$0xff] }
  0x7d   : > { %2035 = vmatmul.mubr.msk.f32.gmra.mrb[6].mxu0 %vm390_vm0, %v387_v13 }
  0x7e   : > { %2061 = vmatprep.mubr.msk.f32.mxu0 %vm629_vm1, %v627_v14 }
  0x7f   : > { %2051 = vmatmul.mubr.msk.f32.gmra.mrb[6].mxu1 %vm390_vm0, %v387_v13  ;;  %v944_v13 = vld [vmem:[#allocation5 + $0x40] sm:$0xff] }
  0x80   : > { %2072 = vmatprep.mubr.msk.f32.mxu1 %vm629_vm1, %v627_v14 }
 0x144   : > { %v2027_v15 = vpop.f32.mrb[0].mxu0 }
 0x145   : > { %v481_v16 = vpop.f32.mrb[1].mxu0 }
 0x146   : > { %v2043_v17 = vpop.f32.mrb[0].mxu1  ;;  %v2173_v18 = vpack.c.bf16 %v2027_v15, %v481_v16 }
 0x147   : > { %v588_v19 = vpop.f32.mrb[1].mxu1 }
 0x148   : > { %v2177_v20 = vpack.c.bf16 %v2043_v17, %v588_v19  ;;  %v2030_v21 = vpop.f32.mrb[2].mxu0  ;;  %2174 = vmatprep.subr.bf16.mxu0 %v2173_v18  ;;  %v961_v19 = vld [vmem:[#allocation7 + $0x48] sm:$0xff] }
 0x149   : > { %v491_v22 = vpop.f32.mrb[3].mxu0  ;;  %2176 = vmatpush3.bf16.msra.mxu0 %v2173_v18 }
 0x14a   : > { %v2046_v23 = vpop.f32.mrb[2].mxu1  ;;  %v2181_v24 = vpack.c.bf16 %v2030_v21, %v491_v22  ;;  %2178 = vmatprep.subr.bf16.mxu0 %v2177_v20 }
 0x14b   : > { %v598_v25 = vpop.f32.mrb[3].mxu1 }
 0x14c   : > { %v2185_v26 = vpack.c.bf16 %v2046_v23, %v598_v25  ;;  %2182 = vmatprep.subr.bf16.mxu1 %v2181_v24  ;;  %v2033_v27 = vpop.f32.mrb[4].mxu0 }
 0x14d   : > { %2184 = vmatpush3.bf16.msra.mxu1 %v2181_v24  ;;  %v501_v28 = vpop.f32.mrb[5].mxu0  ;;  %2180 = vmatpush3.bf16.msra.mxu0 %v2177_v20 }
 0x14e   : > { %v2049_v29 = vpop.f32.mrb[4].mxu1  ;;  %v2189_v31 = vpack.c.bf16 %v2033_v27, %v501_v28  ;;  %2186 = vmatprep.subr.bf16.mxu1 %v2185_v26  ;;  %v945_v27 = vld [vmem:[#allocation5 + $0x48] sm:$0xff] }
 0x14f   : > { %v608_v32 = vpop.f32.mrb[5].mxu1 }
 0x150   : > { %v2193_v33 = vpack.c.bf16 %v2049_v29, %v608_v32  ;;  %v2036_v34 = vpop.f32.mrb[6].mxu0  ;;  %2190 = vmatprep.subr.bf16.mxu0 %v2189_v31  ;;  %2062 = vmatmul.mubr.msk.f32.vlgmr.msra.gmra.mrb[8].mxu0 %vm629_vm1, %v628_v30 }
 0x151   : > { %v511_v35 = vpop.f32.mrb[7].mxu0  ;;  %2188 = vmatpush3.bf16.msra.mxu1 %v2185_v26  ;;  %2192 = vmatpush3.bf16.msra.mxu0 %v2189_v31 }
 0x152   : > { %v2052_v36 = vpop.f32.mrb[6].mxu1  ;;  %v2197_v37 = vpack.c.bf16 %v2036_v34, %v511_v35  ;;  %2194 = vmatprep.subr.bf16.mxu0 %v2193_v33  ;;  %2083 = vmatprep.mubr.msk.f32.mxu0 %vm629_vm1, %v627_v14  ;;  %v948_v35 = vld [vmem:[#allocation5 + $0x60] sm:$0xff] }
 0x153   : > { %v618_v38 = vpop.f32.mrb[7].mxu1 }
 0x154   : > { %v2201_v39 = vpack.c.bf16 %v2052_v36, %v618_v38  ;;  %2198 = vmatprep.subr.bf16.mxu1 %v2197_v37  ;;  %2073 = vmatmul.mubr.msk.f32.vlgmr.msra.gmra.mrb[8].mxu1 %vm629_vm1, %v628_v30  ;;  %v964_v36 = vld [vmem:[#allocation7 + $0x60] sm:$0xff] }
 0x155   : > { %2200 = vmatpush3.bf16.msra.mxu1 %v2197_v37  ;;  %2196 = vmatpush3.bf16.msra.mxu0 %v2193_v33 }
 0x156   : > { %2202 = vmatprep.subr.bf16.mxu1 %v2201_v39  ;;  %2094 = vmatprep.mubr.msk.f32.mxu1 %vm629_vm1, %v627_v14  ;;  %v960_v14 = vld [vmem:[#allocation7 + $0x40] sm:$0xff] }
 0x158   : > { %2084 = vmatmul.mubr.msk.f32.vlgmr.msra.gmra.mrb[10].mxu0 %vm629_vm1, %v628_v30 }
 0x159   : > { %2204 = vmatpush3.bf16.msra.mxu1 %v2201_v39  ;;  %2101 = vmatprep.mubr.msk.f32.mxu0 %vm390_vm0, %v2758_v40 }
 0x15c   : > { %2095 = vmatmul.mubr.msk.f32.vlgmr.msra.gmra.mrb[10].mxu1 %vm629_vm1, %v628_v30 }
 0x15d   : > { %2111 = vmatprep.mubr.msk.f32.mxu1 %vm390_vm0, %v2758_v40 }
 0x223   : > { %v2764_v45 = vpop.f32.mrb[8].mxu0 }
 0x224   : > { %v2766_v48 = vpop.f32.mrb[9].mxu0  ;;  %v984_v50 = vmul.f32 %v2764_v45, %v952_v42  ;;  %v1061_v51 = vmul.f32 %v2764_v45, %v936_v41  ;;  %v985_v52 = vmul.f32 %v2764_v45, %v953_v44  ;;  %v1062_v53 = vmul.f32 %v2764_v45, %v937_v43 }
 0x225   : > { %v968_v55 = vmul.f32 %v936_v41, %v2766_v48  ;;  %v1045_v56 = vmul.f32 %v952_v42, %v2766_v48  ;;  %v969_v59 = vmul.f32 %v937_v43, %v2766_v48  ;;  %v1046_v60 = vmul.f32 %v953_v44, %v2766_v48  ;;  %v965_v42 = vld [vmem:[#allocation7 + $0x68] sm:$0xff] }
 0x226   : > { %v2777_v61 = vmul.f32 %v938_v46, %v2766_v48  ;;  %v2780_v62 = vmul.f32 %v2764_v45, %v954_v47  ;;  %v2783_v63 = vmul.f32 %v954_v47, %v2766_v48  ;;  %v2786_v0 = vmul.f32 %v2764_v45, %v938_v46 }
 0x227   : > { %v2788_v1 = vpop.f32.mrb[8].mxu1  ;;  %v1000_v2 = vsub.f32 %v968_v55, %v984_v50  ;;  %v1077_v3 = vadd.f32 %v1061_v51, %v1045_v56  ;;  %v1001_v4 = vsub.f32 %v969_v59, %v985_v52  ;;  %v1078_v5 = vadd.f32 %v1062_v53, %v1046_v60  ;;  %v949_v52 = vld [vmem:[#allocation5 + $0x68] sm:$0xff] }
 0x228   : > { %v2790_v6 = vpop.f32.mrb[9].mxu1  ;;  %v988_v7 = vmul.f32 %v2788_v1, %v956_v54  ;;  %v1065_v8 = vmul.f32 %v2788_v1, %v940_v49  ;;  %v989_v9 = vmul.f32 %v2788_v1, %v957_v58  ;;  %v2796_v10 = vmul.f32 %v2788_v1, %v941_v57 }
 0x229   : > { %v972_v15 = vmul.f32 %v940_v49, %v2790_v6  ;;  %v1017_v16 = vsel %vm1016_vm2, %v1000_v2, 0.0  ;;  %v1049_v17 = vmul.f32 %v956_v54, %v2790_v6  ;;  %v1093_v18 = vsel %vm1016_vm2, %v1077_v3, 0.0 }
 0x22a   : > { %v973_v20 = vmul.f32 %v941_v57, %v2790_v6  ;;  %v1024_v21 = vsel %vm1016_vm2, %v1001_v4, 0.0  ;;  %v1050_v22 = vmul.f32 %v957_v58, %v2790_v6  ;;  %v2810_v23 = vsel %vm1016_vm2, %v1078_v5, 0.0 }
 0x22b   : > { %v2812_v24 = vpop.f32.mrb[10].mxu0  ;;  %v1004_v25 = vsub.f32 %v972_v15, %v988_v7  ;;  %v1081_v26 = vadd.f32 %v1065_v8, %v1049_v17  ;;  %v2816_v28 = vmul.f32 %v2798_v11, %v2790_v6  ;;  %v2820_v29 = vmul.f32 %v2788_v1, %v2800_v12 }
 0x22c   : > { %v2822_v30 = vpop.f32.mrb[11].mxu0  ;;  %v992_v31 = vmul.f32 %v2812_v24, %v960_v14  ;;  %v1069_v32 = vmul.f32 %v2812_v24, %v944_v13  ;;  %v993_v33 = vmul.f32 %v2812_v24, %v961_v19  ;;  %v1005_v34 = vsub.f32 %v973_v20, %v989_v9 }
 0x22d   : > { %v976_v37 = vmul.f32 %v944_v13, %v2822_v30  ;;  %v1018_v38 = vsel %vm1016_vm2, %v1004_v25, 0.0  ;;  %v1053_v39 = vmul.f32 %v960_v14, %v2822_v30  ;;  %v1094_v41 = vsel %vm1016_vm2, %v1081_v26, 0.0  ;;  %v946_v13 = vld [vmem:[#allocation5 + $0x50] sm:$0xff] }
 0x22e   : > { %v1019_v43 = vadd.f32 %v1018_v38, %v1017_v16  ;;  %v1095_v44 = vadd.f32 %v1094_v41, %v1093_v18  ;;  %v977_v46 = vmul.f32 %v945_v27, %v2822_v30  ;;  %v1025_v47 = vsel %vm1016_vm2, %v1005_v34, 0.0  ;;  %v950_v14 = vld [vmem:[#allocation5 + $0x70] sm:$0xff] }
 0x22f   : > { %v2833_v49 = vpop.f32.mrb[10].mxu1  ;;  %v1008_v50 = vsub.f32 %v976_v37, %v992_v31  ;;  %v1085_v51 = vadd.f32 %v1069_v32, %v1053_v39  ;;  %v1026_v53 = vadd.f32 %v1025_v47, %v1024_v21  ;;  %v1054_v54 = vmul.f32 %v961_v19, %v2822_v30  ;;  %v962_v26 = vld [vmem:[#allocation7 + $0x50] sm:$0xff] }
 0x230   : > { %v2836_v55 = vpop.f32.mrb[11].mxu1  ;;  %v996_v56 = vmul.f32 %v2833_v49, %v964_v36  ;;  %v1073_v57 = vmul.f32 %v2833_v49, %v948_v35  ;;  %v997_v58 = vmul.f32 %v2833_v49, %v965_v42  ;;  %v1009_v59 = vsub.f32 %v977_v46, %v993_v33  ;;  %v966_v33 = vld [vmem:[#allocation7 + $0x70] sm:$0xff] }
 0x231   : > { %v980_v60 = vmul.f32 %v948_v35, %v2836_v55  ;;  %v1020_v2 = vsel %vm1016_vm2, %v1008_v50, 0.0  ;;  %v1057_v3 = vmul.f32 %v964_v36, %v2836_v55  ;;  %v1096_v4 = vsel %vm1016_vm2, %v1085_v51, 0.0 }
 0x232   : > { %v1021_v5 = vadd.f32 %v1020_v2, %v1019_v43  ;;  %v1097_v7 = vadd.f32 %v1096_v4, %v1095_v44  ;;  %v981_v8 = vmul.f32 %v949_v52, %v2836_v55  ;;  %v1027_v9 = vsel %vm1016_vm2, %v1009_v59, 0.0  ;;  %v947_v4 = vld [vmem:[#allocation5 + $0x58] sm:$0xff] }
 0x233   : > { %v1012_v15 = vsub.f32 %v980_v60, %v996_v56  ;;  %v1089_v16 = vadd.f32 %v1073_v57, %v1057_v3  ;;  %v1028_v17 = vadd.f32 %v1027_v9, %v1026_v53  ;;  %v1058_v18 = vmul.f32 %v965_v42, %v2836_v55  ;;  %v939_v57 = vld [vmem:[#allocation5 + $0x18] sm:$0xff] }
 0x234   : > { %v1013_v19 = vsub.f32 %v981_v8, %v997_v58  ;;  %v1070_v20 = vmul.f32 %v2812_v24, %v945_v27  ;;  %v1074_v21 = vmul.f32 %v2833_v49, %v949_v52  ;;  %v1082_v25 = vadd.f32 %v2796_v10, %v1050_v22 }
 0x235   : > { %v1022_v31 = vsel %vm1016_vm2, %v1012_v15, 0.0  ;;  %v1098_v32 = vsel %vm1016_vm2, %v1089_v16, 0.0  ;;  %v978_v34 = vmul.f32 %v946_v13, %v2822_v30  ;;  %v982_v35 = vmul.f32 %v950_v14, %v2836_v55  ;;  %v951_v15 = vld [vmem:[#allocation5 + $0x78] sm:$0xff] }
 0x236   : > { %v1023_v36 = vadd.f32 %v1022_v31, %v1021_v5  ;;  %v1099_v37 = vadd.f32 %v1098_v32, %v1097_v7  ;;  %v1029_v38 = vsel %vm1016_vm2, %v1013_v19, 0.0  ;;  %v1086_v39 = vadd.f32 %v1070_v20, %v1054_v54  ;;  %v2884_v5 = vld [vmem:[%s3033_s6 + $0x10] sm:$0xff]  ;;  %v955_v16 = vld [vmem:[#allocation7 + $0x18] sm:$0xff] }
 0x237   : > { %v1030_v27 = vadd.f32 %v1029_v38, %v1028_v17  ;;  %v1090_v41 = vadd.f32 %v1074_v21, %v1058_v18  ;;  %v1101_v42 = vsel %vm1016_vm2, %v1082_v25, 0.0  ;;  %v994_v10 = vmul.f32 %v2812_v24, %v962_v26  ;;  %v959_v20 = vld [vmem:[#allocation7 + $0x38] sm:$0xff] }
 0x238   : > { %v2205_v22 = vpack.c.bf16 %v1099_v37, %v1023_v36  ;;  %v1102_v43 = vadd.f32 %v1101_v42, %v2810_v23  ;;  %v1103_v44 = vsel %vm1016_vm2, %v1086_v39, 0.0  ;;  %v998_v46 = vmul.f32 %v2833_v49, %v966_v33  ;;  %v967_v31 = vld [vmem:[#allocation7 + $0x78] sm:$0xff] }
 0x239   : > { %v1105_v47 = vsel %vm1016_vm2, %v1090_v41, 0.0  ;;  %v1002_v50 = vsub.f32 %v2777_v61, %v2780_v62  ;;  %v1006_v51 = vsub.f32 %v2816_v28, %v2820_v29  ;;  %v1010_v52 = vsub.f32 %v978_v34, %v994_v10  ;;  %v943_v28 = vld [vmem:[#allocation5 + $0x38] sm:$0xff]  ;;  %v2876_v29 = vld [vmem:[%s3033_s6 + $0x8] sm:$0xff] }
 0x23a   : > { %2206 = vmatprep.subr.bf16.mxu0 %v2205_v22  ;;  %v1104_v53 = vadd.f32 %v1103_v44, %v1102_v43  ;;  %v1014_v54 = vsub.f32 %v982_v35, %v998_v46  ;;  %v1051_v56 = vmul.f32 %v2800_v12, %v2790_v6  ;;  %v1055_v23 = vmul.f32 %v962_v26, %v2822_v30  ;;  %v963_v26 = vld [vmem:[#allocation7 + $0x58] sm:$0xff] }
 0x23b   : > { %2208 = vmatpush3.bf16.msra.mxu0 %v2205_v22  ;;  %v1031_v58 = vsel %vm1016_vm2, %v1002_v50, 0.0  ;;  %v1032_v59 = vsel %vm1016_vm2, %v1006_v51, 0.0  ;;  %v1034_v61 = vsel %vm1016_vm2, %v1010_v52, 0.0  ;;  %v1059_v62 = vmul.f32 %v966_v33, %v2836_v55 }
 0x23c   : > { %v1106_v60 = vadd.f32 %v1105_v47, %v1104_v53  ;;  %v1033_v12 = vadd.f32 %v1032_v59, %v1031_v58  ;;  %v1036_v2 = vsel %vm1016_vm2, %v1014_v54, 0.0  ;;  %v1067_v3 = vmul.f32 %v2788_v1, %v2798_v11 }
 0x23d   : > { %v1071_v7 = vmul.f32 %v2812_v24, %v946_v13  ;;  %v1075_v8 = vmul.f32 %v2833_v49, %v950_v14  ;;  %v1079_v9 = vadd.f32 %v2786_v0, %v2783_v63  ;;  %v971_v17 = vmul.f32 %v939_v57, %v2766_v48  ;;  %v1124_v0 = vld [vmem:[%s3033_s6 + $0x18] sm:$0xff] }
 0x23e   : > { %v2209_v18 = vpack.c.bf16 %v1106_v60, %v1030_v27  ;;  %v1035_v19 = vadd.f32 %v1034_v61, %v1033_v12  ;;  %v1083_v11 = vadd.f32 %v1067_v3, %v1051_v56  ;;  %v975_v21 = vmul.f32 %v943_v28, %v2790_v6  ;;  %2102 = vmatmul.mubr.msk.f32.vlgmr.msra.gmra.mrb[12].mxu0 %vm390_vm0, %v2876_v29 }
 0x23f   : > { %v1087_v25 = vadd.f32 %v1071_v7, %v1055_v23  ;;  %v1091_v13 = vadd.f32 %v1075_v8, %v1059_v62  ;;  %v1107_v14 = vsel %vm1016_vm2, %v1079_v9, 0.0  ;;  %v979_v63 = vmul.f32 %v947_v4, %v2822_v30  ;;  %2104 = vmatprep.mubr.msk.f32.mxu0 %vm390_vm0, %v2884_v5  ;;  %v1607_v8 = vld [vmem:[%s3035_s8] sm:$0xff] }
 0x240   : > { %2210 = vmatprep.subr.bf16.mxu1 %v2209_v18  ;;  %v1037_v32 = vadd.f32 %v1036_v2, %v1035_v19  ;;  %v1108_v33 = vsel %vm1016_vm2, %v1083_v11, 0.0  ;;  %v983_v34 = vmul.f32 %v951_v15, %v2836_v55  ;;  %v987_v35 = vmul.f32 %v2764_v45, %v955_v16 }
 0x241   : > { %2212 = vmatpush3.bf16.msra.mxu1 %v2209_v18  ;;  %v1109_v36 = vadd.f32 %v1108_v33, %v1107_v14  ;;  %v1110_v37 = vsel %vm1016_vm2, %v1087_v25, 0.0  ;;  %v1112_v38 = vsel %vm1016_vm2, %v1091_v13, 0.0  ;;  %v991_v39 = vmul.f32 %v2788_v1, %v959_v20 }
 0x242   : > { %v995_v27 = vmul.f32 %v2812_v24, %v963_v26  ;;  %v999_v41 = vmul.f32 %v2833_v49, %v967_v31  ;;  %v1003_v42 = vsub.f32 %v971_v17, %v987_v35  ;;  %v1048_v10 = vmul.f32 %v955_v16, %v2766_v48  ;;  %2105 = vmatmul.mubr.msk.f32.gmra.mrb[14].mxu0 %vm390_vm0, %v1124_v0 }
 0x243   : > { %v1111_v22 = vadd.f32 %v1110_v37, %v1109_v36  ;;  %v1007_v43 = vsub.f32 %v975_v21, %v991_v39  ;;  %v1052_v44 = vmul.f32 %v959_v20, %v2790_v6  ;;  %v1056_v46 = vmul.f32 %v963_v26, %v2822_v30  ;;  %2121 = vmatprep.mubr.msk.f32.mxu0 %vm390_vm0, %v2758_v40 }
 0x244   : > { %v1011_v47 = vsub.f32 %v979_v63, %v995_v27  ;;  %v1015_v50 = vsub.f32 %v983_v34, %v999_v41  ;;  %v1038_v51 = vsel %vm1016_vm2, %v1003_v42, 0.0  ;;  %v1060_v52 = vmul.f32 %v967_v31, %v2836_v55  ;;  %2112 = vmatmul.mubr.msk.f32.vlgmr.msra.gmra.mrb[12].mxu1 %vm390_vm0, %v2876_v29 }
 0x245   : > { %v1113_v48 = vadd.f32 %v1112_v38, %v1111_v22  ;;  %v1039_v53 = vsel %vm1016_vm2, %v1007_v43, 0.0  ;;  %v1064_v54 = vmul.f32 %v2764_v45, %v939_v57  ;;  %v1068_v6 = vmul.f32 %v2788_v1, %v943_v28  ;;  %2114 = vmatprep.mubr.msk.f32.mxu1 %vm390_vm0, %v2884_v5 }
 0x246   : > { %v1040_v30 = vadd.f32 %v1039_v53, %v1038_v51  ;;  %v1041_v56 = vsel %vm1016_vm2, %v1011_v47, 0.0  ;;  %v1043_v23 = vsel %vm1016_vm2, %v1015_v50, 0.0  ;;  %v1072_v55 = vmul.f32 %v2812_v24, %v947_v4 }
 0x247   : > { %v2213_v58 = vpack.c.bf16 %v1113_v48, %v1037_v32  ;;  %v1076_v59 = vmul.f32 %v2833_v49, %v951_v15  ;;  %v1080_v61 = vadd.f32 %v1064_v54, %v1048_v10  ;;  %v1084_v62 = vadd.f32 %v1068_v6, %v1052_v44 }
 0x248   : > { %v1042_v60 = vadd.f32 %v1041_v56, %v1040_v30  ;;  %v1088_v12 = vadd.f32 %v1072_v55, %v1056_v46  ;;  %2115 = vmatmul.mubr.msk.f32.gmra.mrb[14].mxu1 %vm390_vm0, %v1124_v0 }
 0x249   : > { %2214 = vmatprep.subr.bf16.mxu0 %v2213_v58  ;;  %v1092_v45 = vadd.f32 %v1076_v59, %v1060_v52  ;;  %v1114_v1 = vsel %vm1016_vm2, %v1080_v61, 0.0  ;;  %v1115_v57 = vsel %vm1016_vm2, %v1084_v62, 0.0  ;;  %2131 = vmatprep.mubr.msk.f32.mxu1 %vm390_vm0, %v2758_v40  ;;  %v1477_v40 = vld [vmem:[%s3034_s7] sm:$0xff] }
 0x24a   : > { %v1044_v28 = vadd.f32 %v1043_v23, %v1042_v60  ;;  %v1116_v24 = vadd.f32 %v1115_v57, %v1114_v1  ;;  %v1117_v2 = vsel %vm1016_vm2, %v1088_v12, 0.0  ;;  %2216 = vmatpush3.bf16.msra.mxu0 %v2213_v58 }
 0x24b   : > { %v1119_v49 = vsel %vm1016_vm2, %v1092_v45, 0.0  ;;  %2137 = vmatprep.subr.mxu0 %v1477_v40 }
 0x24c   : > { %v1118_v3 = vadd.f32 %v1117_v2, %v1116_v24 }
 0x24d   : > { %2122 = vmatmul.mubr.msk.f32.vlgmr.msra.gmra.mrb[16].mxu0 %vm390_vm0, %v2876_v29 }
 0x24e   : > { %v1120_v4 = vadd.f32 %v1119_v49, %v1118_v3  ;;  %2124 = vmatprep.mubr.msk.f32.mxu0 %vm390_vm0, %v2884_v5  ;;  %2138 = vmatpush3.msra.mxu0 %v1477_v40 }
 0x250   : > { %v2217_v7 = vpack.c.bf16 %v1120_v4, %v1044_v28 }
 0x251   : > { %2125 = vmatmul.mubr.msk.f32.gmra.mrb[18].mxu0 %vm390_vm0, %v1124_v0 }
 0x252   : > { %2218 = vmatprep.subr.bf16.mxu1 %v2217_v7 }
 0x253   : > { %2220 = vmatpush3.bf16.msra.mxu1 %v2217_v7 }
 0x254   : > { %2151 = vmatprep.subr.mxu1 %v1607_v8 }
 0x256   : > { %2132 = vmatmul.mubr.msk.f32.vlgmr.msra.gmra.mrb[16].mxu1 %vm390_vm0, %v2876_v29 }
 0x257   : > { %2134 = vmatprep.mubr.msk.f32.mxu1 %vm390_vm0, %v2884_v5  ;;  %2152 = vmatpush3.msra.mxu1 %v1607_v8 }
 0x25a   : > { %2135 = vmatmul.mubr.msk.f32.gmra.mrb[18].mxu1 %vm390_vm0, %v1124_v0 }
 0x311   : > { %v2103_v9 = vpop.f32.mrb[12].mxu0 }
 0x312   : > { %v1203_v15 = vpop.f32.mrb[13].mxu0 }
 0x313   : > { %2139 = vmatprep.mubr.msk.f32.mxu0 %vm1016_vm2, %v1203_v15 }
 0x314   : > { %2140 = vmatmul.mubr.msk.f32.vlgmr.msra.gmra.mrb[20].mxu0 %vm1016_vm2, %v2103_v9 }
 0x315   : > { %v2106_v29 = vpop.f32.mrb[14].mxu0 }
 0x316   : > { %v1213_v5 = vpop.f32.mrb[15].mxu0 }
 0x317   : > { %v2113_v16 = vpop.f32.mrb[12].mxu1  ;;  %2153 = vmatprep.mubr.msk.f32.mxu1 %vm1016_vm2, %v1213_v5 }
 0x318   : > { %v1288_v17 = vpop.f32.mrb[13].mxu1  ;;  %2154 = vmatmul.mubr.msk.f32.vlgmr.msra.gmra.mrb[20].mxu1 %vm1016_vm2, %v2106_v29 }
 0x319   : > { %2142 = vmatprep.mubr.msk.f32.mxu0 %vm1016_vm2, %v1288_v17 }
 0x31a   : > { %2143 = vmatmul.mubr.msk.f32.gmra.mrb[22].mxu0 %vm1016_vm2, %v2113_v16 }
 0x31b   : > { %v2116_v18 = vpop.f32.mrb[14].mxu1 }
 0x31c   : > { %v1298_v19 = vpop.f32.mrb[15].mxu1 }
 0x31d   : > { %2156 = vmatprep.mubr.msk.f32.mxu1 %vm1016_vm2, %v1298_v19 }
 0x31e   : > { %2157 = vmatmul.mubr.msk.f32.gmra.mrb[22].mxu1 %vm1016_vm2, %v2116_v18 }
 0x320   : > { %v2123_v11 = vpop.f32.mrb[16].mxu0 }
 0x321   : > { %v1373_v20 = vpop.f32.mrb[17].mxu0 }
 0x322   : > { %2145 = vmatprep.mubr.msk.f32.mxu0 %vm1016_vm2, %v1373_v20 }
 0x323   : > { %2146 = vmatmul.mubr.msk.f32.gmra.mrb[24].mxu0 %vm1016_vm2, %v2123_v11 }
 0x324   : > { %v2126_v21 = vpop.f32.mrb[18].mxu0 }
 0x325   : > { %v1383_v25 = vpop.f32.mrb[19].mxu0 }
 0x326   : > { %2159 = vmatprep.mubr.msk.f32.mxu1 %vm1016_vm2, %v1383_v25 }
 0x327   : > { %2160 = vmatmul.mubr.msk.f32.gmra.mrb[24].mxu1 %vm1016_vm2, %v2126_v21 }
 0x329   : > { %v2133_v13 = vpop.f32.mrb[16].mxu1 }
 0x32a   : > { %v1458_v14 = vpop.f32.mrb[17].mxu1 }
 0x32b   : > { %2148 = vmatprep.mubr.msk.f32.mxu0 %vm1016_vm2, %v1458_v14 }
 0x32c   : > { %2149 = vmatmul.mubr.msk.f32.gmra.mrb[26].mxu0 %vm1016_vm2, %v2133_v13 }
 0x32d   : > { %v2136_v26 = vpop.f32.mrb[18].mxu1 }
 0x32e   : > { %v1468_v31 = vpop.f32.mrb[19].mxu1 }
 0x32f   : > { %2162 = vmatprep.mubr.msk.f32.mxu1 %vm1016_vm2, %v1468_v31 }
 0x330   : > { %2163 = vmatmul.mubr.msk.f32.gmra.mrb[26].mxu1 %vm1016_vm2, %v2136_v26 }
 0x3e7   : > { %v2141_v63 = vpop.f32.mrb[20].mxu0 }
 0x3e8   : > { %v1568_v0 = vpop.f32.mrb[21].mxu0 }
 0x3eb   : > { %v2155_v32 = vpop.f32.mrb[20].mxu1 }
 0x3ec   : > { %v1738_v33 = vsub.f32 %v2141_v63, %v2155_v32  ;;  %v1698_v34 = vpop.f32.mrb[21].mxu1 }
 0x3ed   : > { %v1737_v35 = vsub.f32 %v1568_v0, %v1698_v34  ;;  %v2144_v36 = vpop.f32.mrb[22].mxu0 }
 0x3ee   : > { %1746 = vst.msk [vmem:[%s379_s16 + $0x8] sm:$0xff] %vm390_vm0, %v1738_v33  ;;  %v1578_v37 = vpop.f32.mrb[23].mxu0 }
 0x3ef   : > { %1745 = vst.msk [vmem:[%s379_s16] sm:$0xff] %vm390_vm0, %v1737_v35 }
 0x3f1   : > { %v2158_v38 = vpop.f32.mrb[22].mxu1 }
 0x3f2   : > { %v1740_v39 = vsub.f32 %v2144_v36, %v2158_v38  ;;  %v1708_v27 = vpop.f32.mrb[23].mxu1 }
 0x3f3   : > { %v1739_v41 = vsub.f32 %v1578_v37, %v1708_v27 }
 0x3f4   : > { %1748 = vst.msk [vmem:[%s379_s16 + $0x18] sm:$0xff] %vm390_vm0, %v1740_v39 }
 0x3f5   : > { %1747 = vst.msk [vmem:[%s379_s16 + $0x10] sm:$0xff] %vm390_vm0, %v1739_v41 }
 0x3f6   : > { %v2147_v42 = vpop.f32.mrb[24].mxu0 }
 0x3f7   : > { %v1588_v10 = vpop.f32.mrb[25].mxu0 }
 0x3fa   : > { %v2161_v22 = vpop.f32.mrb[24].mxu1 }
 0x3fb   : > { %v1742_v43 = vsub.f32 %v2147_v42, %v2161_v22  ;;  %v1718_v44 = vpop.f32.mrb[25].mxu1 }
 0x3fc   : > { %v1741_v46 = vsub.f32 %v1588_v10, %v1718_v44 }
 0x3fd   : > { %1750 = vst.msk [vmem:[%s379_s16 + $0x28] sm:$0xff] %vm390_vm0, %v1742_v43 }
 0x3fe   : > { %1749 = vst.msk [vmem:[%s379_s16 + $0x20] sm:$0xff] %vm390_vm0, %v1741_v46 }
 0x3ff   : > { %v2150_v47 = vpop.f32.mrb[26].mxu0 }
 0x400   : > { %v1598_v50 = vpop.f32.mrb[27].mxu0 }
 0x403   : > { %v2164_v51 = vpop.f32.mrb[26].mxu1 }
 0x404   : > { %v1744_v52 = vsub.f32 %v2150_v47, %v2164_v51  ;;  %v1728_v48 = vpop.f32.mrb[27].mxu1 }
 0x405   : > { %v1743_v53 = vsub.f32 %v1598_v50, %v1728_v48 }
 0x406   : > { %1752 = vst.msk [vmem:[%s379_s16 + $0x38] sm:$0xff] %vm390_vm0, %v1744_v52 }
 0x407   : > { %1751 = vst.msk [vmem:[%s379_s16 + $0x30] sm:$0xff] %vm390_vm0, %v1743_v53 }
 0x408   : > { %2391 = shalt.err (!%p2388_p1)
}
 0x409   : > { %s2392_s17 = scalar_lea.hbm %s2979_s19, 1024  ;;  %s2396_s28 = scalar_lea.hbm %s3036_s9, 2048 }
 0x40a   : > { %p2393_p13 = scmp.ne.s32.totalorder %s2979_s19, %s2392_s17  ;;  %p2397_p4 = scmp.lt.u32.totalorder %s2979_s19, %s3036_s9 }
 0x40b   : > { %p2398_p5 = scmp.lt.u32.totalorder %s2396_s28, %s2392_s17  ;;  %p2400_p11 = scmp.lt.u32.totalorder %s2392_s17, %s2979_s19 }
 0x40c   : > { %p2394_p6 = pnand %p2393_p13, %p3056_p0 }
 0x40d   : > { %p2399_p8 = por %p2398_p5, %p2397_p4 }
 0x40e   : > { %p2395_p10 = pneg %p2394_p6 }
 0x40f   : > { %p2401_p2 = por %p2400_p11, %p2399_p8 }
 0x411   : > { %p2402_p3 = pnand %p2401_p2, %p2395_p10 }
 0x413   : > { %2405 = shalt.err (!%p2402_p3)
}
 0x414   : > { %s2456_s21 = smov 128   ;;  %s2457_s14 = smov 8  }
 0x415   : > { %2231 = dma.vmem_to_hbm [thread:$0]  (%p3056_p0), %s2981_s25, 1024, %s2979_s19, %s1754_s13, %s2456_s21, %s2456_s21, %s2457_s14  }
 0x416 PF: > { %s3057_s29 = sld [smem:[#allocation12_spill]]  ;;  %s1782_s24 = sand.u32 1, %s2436_s30  }
 0x417   : > { %p3059_p9 = scmp.ge.s32.totalorder %s2448_s12, 2  ;;  %s1783_s17 = scalar_lea.sflag [#allocation4], %s1782_s24 }
 0x41c   : > { %p3058_p7 = scmp.ne.s32.totalorder %s3057_s29, 0 }
 0x41e   : > { %p2245_p12 = pnand %p3059_p9, %p3058_p7 }
 0x420   : > { %2431 = dma.done.wait (!%p2245_p12), %s1783_s17, 1024  }
 0x421   : > { %2433 = vsyncadd (!%p2245_p12), %s1783_s17, 4294966272  ;;  %p23_p1 = scmp.ge.s32.totalorder %s2624_s20, 4   ;;  %s3060_s30 = smov %s2440_s10 }
 0x422   : > { %s3061_s10 = smov %s2444_s11  ;;  %s3062_s11 = smov %s2640_s27 }
 0x423   : > { %s3063_s12 = smov %s2624_s20  ;;  %25 = sbr.rel (!%p23_p1) target bundleno = 6 (0x6), region = 109 }
 0x42a   :  { %1788 = vsyncpa [#allocation3], 1 }
 0x42b   :  { %1790 = vsyncpa [#allocation3 + $0x1], 1 }
 0x42c   :  { %1791 = vsyncpa [#allocation6], 1 }
 0x42d   :  { %1792 = vsyncpa [#allocation4], 1 }
 0x42e   :  { %1794 = vsyncpa [#allocation4 + $0x1], 1 }

</bundles_post_ra>
